<compile_context>
chip_gen: v7x
topology: tpu7x:2x2x1
jax: 0.10.0
libtpu: 0.0.40
codegen_flags: <defaults>
</compile_context>

<pallas_src>
import functools

import numpy as np
import jax
import jax.numpy as jnp
from jax import lax
from jax.experimental import pallas as pl
from jax.experimental.pallas import tpu as pltpu

_EPS = 1e-5
_LANE = 128          # channel padding target (lane-dense stores); use 256 on v6e/v7x
                     # when the real channel count is large enough to fill the MXU.
_MAX_TM = 512        # row-tile target (large tiles ~85% of HBM roofline in ref sweeps)
_VMEM_LIMIT = 32 * 1024 * 1024


def _round_up(x, m):
    return (x + m - 1) // m * m


# -----------------------------------------------------------------------------------
# Kernel 1: conv1 (centre-tap matmul) + per-tile bn1 partial sums.
# -----------------------------------------------------------------------------------
def _conv1_stats_kernel(x_ref, w1_ref, y_ref, st_ref):
    # x_ref: (TM, Cin_p) bf16   w1_ref: (Cin_p, Cp) bf16
    # y_ref: (TM, Cp) f32       st_ref: (1, 2, Cp) f32  -> [sum, sum_sq] of this tile
    y = jnp.dot(x_ref[...], w1_ref[...], preferred_element_type=jnp.float32)
    y_ref[...] = y
    st_ref[0, 0:1, :] = jnp.sum(y, axis=0, keepdims=True)
    st_ref[0, 1:2, :] = jnp.sum(y * y, axis=0, keepdims=True)


# -----------------------------------------------------------------------------------
# Kernel 2: bn1 (folded scale/shift) + ReLU + conv2 (1x1 matmul) + per-tile bn2 sums.
# -----------------------------------------------------------------------------------
def _bn1_conv2_stats_kernel(n_valid, y_ref, ab1_ref, w2_ref, z_ref, st_ref):
    tm = y_ref.shape[0]
    h = jnp.maximum(y_ref[...] * ab1_ref[0:1, :] + ab1_ref[1:2, :], 0.0)
    # zero the zero-padded rows so they do not pollute the bn2 statistics
    row = pl.program_id(0) * tm + lax.broadcasted_iota(jnp.int32, (tm, 1), 0)
    h = jnp.where(row < n_valid, h, 0.0)
    z = jnp.dot(h.astype(jnp.bfloat16), w2_ref[...], preferred_element_type=jnp.float32)
    z_ref[...] = z
    st_ref[0, 0:1, :] = jnp.sum(z, axis=0, keepdims=True)
    st_ref[0, 1:2, :] = jnp.sum(z * z, axis=0, keepdims=True)


# -----------------------------------------------------------------------------------
# Kernel 3: bn2 (folded scale/shift) + residual add + ReLU.
#   interior rows : relu(z * scale2 + shift2 + identity)
#   border value  : relu(0 * scale2 + shift2 + identity)   (conv2's zero border)
# -----------------------------------------------------------------------------------
def _bn2_residual_kernel(z_ref, ab2_ref, id_ref, int_ref, bor_ref):
    scale2 = ab2_ref[0:1, :]
    shift2 = ab2_ref[1:2, :]
    ident = id_ref[...]
    int_ref[...] = jnp.maximum(z_ref[...] * scale2 + shift2 + ident, 0.0)
    bor_ref[...] = jnp.maximum(shift2 + ident, 0.0)


def residual_block_forward(x, conv1_w, conv2_w, g1, b1, g2, b2,
                           stride=1, downsample=None):
    """Pallas implementation of ResidualBlock.forward (NCHW in / NCHW out)."""
    if stride != 1:
        # TODO(synk): stride > 1 (module default is 1) changes both conv output grids;
        # not implemented.
        raise NotImplementedError("stride != 1 not implemented")

    N, Cin, H, W = x.shape
    Cout = conv1_w.shape[0]
    if H != 1 or W != 1:
        # TODO(synk): for H,W > 1 the torch module itself fails at `out += identity`
        # (out is (H+2, W+2)); only the runnable 1x1 case is implemented.
        raise NotImplementedError("ResidualBlock only broadcasts for 1x1 spatial inputs")

    H1, W1 = H, W                   # conv1: 3x3, pad 1, stride 1 -> same spatial
    H2, W2 = H1 + 2, W1 + 2         # conv2: 1x1, pad 1 -> spatial grows by 2
    M1 = N * H1 * W1                # un-padded conv output rows (= N here)
    M2 = N * H2 * W2                # bn2 divisor: zero border positions INCLUDED

    identity = downsample(x) if downsample is not None else x
    Ni, Ci, Hi, Wi = identity.shape
    assert Ni == N and Hi == 1 and Wi == 1 and Ci in (1, Cout), \
        "identity must be broadcastable against the (N, Cout, H+2, W+2) output"

    f32, bf16 = jnp.float32, jnp.bfloat16
    Cp = _round_up(Cout, _LANE)
    Cin_p = _round_up(Cin, _LANE)
    TM = min(_MAX_TM, _round_up(M1, _LANE))
    Mp = _round_up(M1, TM)
    T = Mp // TM

    # ---- glue: channel-last 2-D layouts, zero padding, bf16 casts ----
    x2d = jnp.pad(x.reshape(N, Cin).astype(f32),
                  ((0, Mp - M1), (0, Cin_p - Cin))).astype(bf16)
    # centre tap of the 3x3 kernel (the only tap that sees real data at 1x1 input)
    w1c = jnp.pad(conv1_w[:, :, 1, 1].T.astype(f32),
                  ((0, Cin_p - Cin), (0, Cp - Cout))).astype(bf16)
    w2m = jnp.pad(conv2_w[:, :, 0, 0].T.astype(f32),
                  ((0, Cp - Cout), (0, Cp - Cout))).astype(bf16)

    id2d = identity.reshape(N, Ci).astype(f32)
    if Ci == 1:
        id2d = jnp.broadcast_to(id2d, (N, Cout))
    id2d = jnp.pad(id2d, ((0, Mp - M1), (0, Cp - Cout)))

    cparams = pltpu.CompilerParams(dimension_semantics=("parallel",),
                                   vmem_limit_bytes=_VMEM_LIMIT)

    # ---- kernel 1: conv1 + bn1 partial stats (row-tiled, pipelined) ----
    y, st1 = pl.pallas_call(
        _conv1_stats_kernel,
        grid=(T,),
        in_specs=[pl.BlockSpec((TM, Cin_p), lambda t: (t, 0)),
                  pl.BlockSpec((Cin_p, Cp), lambda t: (0, 0))],
        out_specs=(pl.BlockSpec((TM, Cp), lambda t: (t, 0)),
                   pl.BlockSpec((1, 2, Cp), lambda t: (t, 0, 0))),
        out_shape=(jax.ShapeDtypeStruct((Mp, Cp), f32),
                   jax.ShapeDtypeStruct((T, 2, Cp), f32)),
        compiler_params=cparams,
        cost_estimate=pl.CostEstimate(
            flops=2 * Mp * Cin_p * Cp, transcendentals=0,
            bytes_accessed=Mp * Cin_p * 2 + Cin_p * Cp * 2 + Mp * Cp * 4 + T * 2 * Cp * 4),
    )(x2d, w1c)

    # bn1 finalize (tiny per-channel math): fold gamma*rsqrt into scale, beta-m*scale
    # into shift, so the in-kernel normalize is a single fused multiply-add.
    mean1 = jnp.sum(st1[:, 0, :], axis=0) / M1
    var1 = jnp.maximum(jnp.sum(st1[:, 1, :], axis=0) / M1 - mean1 * mean1, 0.0)
    scale1 = jnp.pad(g1.astype(f32), (0, Cp - Cout)) * lax.rsqrt(var1 + _EPS)
    shift1 = jnp.pad(b1.astype(f32), (0, Cp - Cout)) - mean1 * scale1
    ab1 = jnp.stack([scale1, shift1])                       # one fused (2, Cp) buffer

    # ---- kernel 2: bn1 + relu + conv2 + bn2 partial stats ----
    z, st2 = pl.pallas_call(
        functools.partial(_bn1_conv2_stats_kernel, M1),
        grid=(T,),
        in_specs=[pl.BlockSpec((TM, Cp), lambda t: (t, 0)),
                  pl.BlockSpec((2, Cp), lambda t: (0, 0)),
                  pl.BlockSpec((Cp, Cp), lambda t: (0, 0))],
        out_specs=(pl.BlockSpec((TM, Cp), lambda t: (t, 0)),
                   pl.BlockSpec((1, 2, Cp), lambda t: (t, 0, 0))),
        out_shape=(jax.ShapeDtypeStruct((Mp, Cp), f32),
                   jax.ShapeDtypeStruct((T, 2, Cp), f32)),
        compiler_params=cparams,
        cost_estimate=pl.CostEstimate(
            flops=2 * Mp * Cp * Cp + 4 * Mp * Cp, transcendentals=0,
            bytes_accessed=Mp * Cp * 8 + Cp * Cp * 2 + 2 * Cp * 4 + T * 2 * Cp * 4),
    )(y, ab1, w2m)

    # bn2 finalize.  conv2's one-pixel border is exactly zero, so the sums over the M1
    # interior rows equal the sums over all M2 padded positions; the divisor MUST be M2.
    mean2 = jnp.sum(st2[:, 0, :], axis=0) / M2
    var2 = jnp.maximum(jnp.sum(st2[:, 1, :], axis=0) / M2 - mean2 * mean2, 0.0)
    scale2 = jnp.pad(g2.astype(f32), (0, Cp - Cout)) * lax.rsqrt(var2 + _EPS)
    shift2 = jnp.pad(b2.astype(f32), (0, Cp - Cout)) - mean2 * scale2
    ab2 = jnp.stack([scale2, shift2])

    # ---- kernel 3: bn2 + residual + relu ----
    out_int, out_bor = pl.pallas_call(
        _bn2_residual_kernel,
        grid=(T,),
        in_specs=[pl.BlockSpec((TM, Cp), lambda t: (t, 0)),
                  pl.BlockSpec((2, Cp), lambda t: (0, 0)),
                  pl.BlockSpec((TM, Cp), lambda t: (t, 0))],
        out_specs=(pl.BlockSpec((TM, Cp), lambda t: (t, 0)),
                   pl.BlockSpec((TM, Cp), lambda t: (t, 0))),
        out_shape=(jax.ShapeDtypeStruct((Mp, Cp), f32),
                   jax.ShapeDtypeStruct((Mp, Cp), f32)),
        compiler_params=cparams,
        cost_estimate=pl.CostEstimate(
            flops=5 * Mp * Cp, transcendentals=0,
            bytes_accessed=Mp * Cp * 16 + 2 * Cp * 4),
    )(z, ab2, id2d)

    # ---- glue: assemble the NCHW output (border value everywhere, interior rows set) ----
    inter = out_int[:M1, :Cout].reshape(N, H1, W1, Cout)
    border = out_bor[:M1, :Cout].reshape(N, 1, 1, Cout)
    out_nhwc = jnp.broadcast_to(border, (N, H2, W2, Cout))
    out_nhwc = out_nhwc.at[:, 1:1 + H1, 1:1 + W1, :].set(inter)
    return jnp.transpose(out_nhwc, (0, 3, 1, 2))


def reference_forward(x, conv1_w, conv2_w, g1, b1, g2, b2, match_mxu_bf16=True):
    """Pure-JAX reference of the exact PyTorch forward (training-mode BN).

    With match_mxu_bf16=True the convolution operands are rounded to bfloat16 (the
    Pallas kernel feeds the MXU in bf16 with f32 accumulation, per the performance
    feedback), so the comparison tolerance can stay tight; the structure (conv -> BN
    -> ReLU -> conv -> BN -> +identity -> ReLU) is unchanged."""
    f32 = jnp.float32

    def mxu(t):
        return t.astype(jnp.bfloat16).astype(f32) if match_mxu_bf16 else t

    def bn(t, g, b):
        m = jnp.mean(t, axis=(0, 2, 3), keepdims=True)
        v = jnp.mean((t - m) ** 2, axis=(0, 2, 3), keepdims=True)
        return (t - m) * lax.rsqrt(v + _EPS) * g.reshape(1, -1, 1, 1) + b.reshape(1, -1, 1, 1)

    dn = ("NCHW", "OIHW", "NCHW")
    out = lax.conv_general_dilated(mxu(x), mxu(conv1_w), (1, 1), ((1, 1), (1, 1)),
                                   dimension_numbers=dn)
    out = jnp.maximum(bn(out, g1, b1), 0.0)
    out = lax.conv_general_dilated(mxu(out), mxu(conv2_w), (1, 1), ((1, 1), (1, 1)),
                                   dimension_numbers=dn)
    out = bn(out, g2, b2) + x
    return jnp.maximum(out, 0.0)


if __name__ == "__main__":
    # Spatial must be 1x1: the torch module's own `out += identity` only broadcasts then
    # (conv2 with kernel_size=1, padding=1 grows the spatial dims by 2).
    N, C, H, W = 4, 8, 1, 1

    key = jax.random.PRNGKey(0)
    k1, k2, k3, k4, k5, k6, k7 = jax.random.split(key, 7)
    x = jax.random.normal(k1, (N, C, H, W), jnp.float32)
    conv1_w = 0.2 * jax.random.normal(k2, (C, C, 3, 3), jnp.float32)   # Conv2d(C, C, 3, bias=False)
    conv2_w = 0.2 * jax.random.normal(k3, (C, C, 1, 1), jnp.float32)   # Conv2d(C, C, 1, bias=False)
    g1 = 1.0 + 0.1 * jax.random.normal(k4, (C,), jnp.float32)          # bn1.weight
    b1 = 0.1 * jax.random.normal(k5, (C,), jnp.float32)                # bn1.bias
    g2 = 1.0 + 0.1 * jax.random.normal(k6, (C,), jnp.float32)          # bn2.weight
    b2 = 0.1 * jax.random.normal(k7, (C,), jnp.float32)                # bn2.bias

    out = jax.block_until_ready(residual_block_forward(x, conv1_w, conv2_w, g1, b1, g2, b2))
    assert out.shape == (N, C, H + 2, W + 2), out.shape

    ref = jax.block_until_ready(reference_forward(x, conv1_w, conv2_w, g1, b1, g2, b2))
    # tolerance covers bf16 MXU rounding (the reference mirrors the bf16 operand cast);
    # any structural error (wrong stats divisor, layout, scatter) is orders larger.
    np.testing.assert_allclose(np.asarray(out), np.asarray(ref), rtol=2e-2, atol=2e-2)

    print("KERNEL_OK")
</pallas_src>

<mosaic_0001>
module attributes {stable_mosaic.version = 11 : i64} {
  func.func @_conv1_stats_kernel(%arg0: i32, %arg1: memref<128x128xbf16, #tpu.memory_space<vmem>>, %arg2: memref<128x128xbf16, #tpu.memory_space<vmem>>, %arg3: memref<128x128xf32, #tpu.memory_space<vmem>>, %arg4: memref<1x2x128xf32, #tpu.memory_space<vmem>>) attributes {dimension_semantics = [#tpu.dimension_semantics<parallel>], iteration_bounds = array<i64: 1>, scalar_prefetch = 0 : i64, scratch_operands = 0 : i64, tpu.core_type = #tpu.core_type<tc>, window_params = [{transform_indices = @transform_0, window_bounds = array<i64: 128, 128>}, {pipeline_mode = #tpu.pipeline_mode<synchronous>, transform_indices = @transform_1, window_bounds = array<i64: 128, 128>}, {transform_indices = @transform_2, window_bounds = array<i64: 128, 128>}, {transform_indices = @transform_3, window_bounds = array<i64: 1, 2, 128>}]} {
    %c0 = arith.constant 0 : index
    %c0_0 = arith.constant 0 : index
    %0 = vector.load %arg1[%c0, %c0_0] : memref<128x128xbf16, #tpu.memory_space<vmem>>, vector<128x128xbf16>
    %c0_1 = arith.constant 0 : index
    %c0_2 = arith.constant 0 : index
    %1 = vector.load %arg2[%c0_1, %c0_2] : memref<128x128xbf16, #tpu.memory_space<vmem>>, vector<128x128xbf16>
    %cst = arith.constant dense<0.000000e+00> : vector<128x128xf32>
    %2 = tpu.matmul %0, %1, %cst {dimension_numbers = #tpu.dot_dimension_numbers<[1], [0], [0], [1], [0, 0, 1, 1], [], []>} : vector<128x128xbf16>, vector<128x128xbf16>, vector<128x128xf32> -> vector<128x128xf32>
    %c0_3 = arith.constant 0 : index
    %c0_4 = arith.constant 0 : index
    %3 = vector.load %arg3[%c0_3, %c0_4] : memref<128x128xf32, #tpu.memory_space<vmem>>, vector<128x128xf32>
    tpu.vector_store %arg3[%c0_3, %c0_4], %2 {strides = array<i32>} : memref<128x128xf32, #tpu.memory_space<vmem>>, vector<128x128xf32>,
    %cst_5 = arith.constant dense<0.000000e+00> : vector<128xf32>
    %4 = vector.multi_reduction <add>, %2, %cst_5 [0] : vector<128x128xf32> to vector<128xf32>
    %5 = vector.shape_cast %4 : vector<128xf32> to vector<1x128xf32>
    %c0_6 = arith.constant 0 : index
    %c0_7 = arith.constant 0 : index
    %c0_8 = arith.constant 0 : index
    %6 = vector.load %arg4[%c0_6, %c0_7, %c0_8] : memref<1x2x128xf32, #tpu.memory_space<vmem>>, vector<1x1x128xf32>
    %7 = vector.shape_cast %6 : vector<1x1x128xf32> to vector<1x128xf32>
    %8 = vector.shape_cast %5 : vector<1x128xf32> to vector<1x1x128xf32>
    tpu.vector_store %arg4[%c0_6, %c0_7, %c0_8], %8 {strides = array<i32>} : memref<1x2x128xf32, #tpu.memory_space<vmem>>, vector<1x1x128xf32>,
    %9 = arith.mulf %2, %2 : vector<128x128xf32>
    %cst_9 = arith.constant dense<0.000000e+00> : vector<128xf32>
    %10 = vector.multi_reduction <add>, %9, %cst_9 [0] : vector<128x128xf32> to vector<128xf32>
    %11 = vector.shape_cast %10 : vector<128xf32> to vector<1x128xf32>
    %c0_10 = arith.constant 0 : index
    %c1 = arith.constant 1 : index
    %c0_11 = arith.constant 0 : index
    %12 = vector.load %arg4[%c0_10, %c1, %c0_11] : memref<1x2x128xf32, #tpu.memory_space<vmem>>, vector<1x1x128xf32>
    %13 = vector.shape_cast %12 : vector<1x1x128xf32> to vector<1x128xf32>
    %14 = vector.shape_cast %11 : vector<1x128xf32> to vector<1x1x128xf32>
    tpu.vector_store %arg4[%c0_10, %c1, %c0_11], %14 {strides = array<i32>} : memref<1x2x128xf32, #tpu.memory_space<vmem>>, vector<1x1x128xf32>,
    return
  }
  func.func @transform_0(%arg0: i32) -> (i32, i32) {
    %c0_i32 = arith.constant 0 : i32
    %c0_i32_0 = arith.constant 0 : i32
    return %arg0, %c0_i32 : i32, i32
  }
  func.func @transform_1(%arg0: i32) -> (i32, i32) {
    %c0_i32 = arith.constant 0 : i32
    %c0_i32_0 = arith.constant 0 : i32
    %c0_i32_1 = arith.constant 0 : i32
    return %c0_i32, %c0_i32_0 : i32, i32
  }
  func.func @transform_2(%arg0: i32) -> (i32, i32) {
    %c0_i32 = arith.constant 0 : i32
    %c0_i32_0 = arith.constant 0 : i32
    return %arg0, %c0_i32 : i32, i32
  }
  func.func @transform_3(%arg0: i32) -> (i32, i32, i32) {
    %c0_i32 = arith.constant 0 : i32
    %c0_i32_0 = arith.constant 0 : i32
    %c0_i32_1 = arith.constant 0 : i32
    return %arg0, %c0_i32, %c0_i32_0 : i32, i32, i32
  }
}

</mosaic_0001>

<bundles_post_ra>
// kernel: tpu_custom_call.1
= control target key start
LH: loop header
LB: loop body
LE: loop exit
PB: predicated region body
PF: predicated region fallthrough
CT: control target
= control target key end

     0   :  { %9 = vsyncpa [#allocation3], 0  ;;  %s671_s0 = inlined_call_operand.hbm [shape: bf16[128,128], index: 0, kind: input, shape index: {}]   ;;  %s672_s1 = inlined_call_operand.hbm [shape: bf16[128,128], index: 1, kind: input, shape index: {}]   ;;  %s673_s2 = inlined_call_operand.hbm [shape: f32[128,128], index: 2, kind: output, shape index: {0}]   ;;  %s674_s3 = inlined_call_operand.hbm [shape: f32[1,2,128], index: 3, kind: output, shape index: {1}]  }
   0x1   :  { %10 = vsyncpa [#allocation6], 0 }
   0x2   :  { %11 = vsyncpa [#allocation4], 0 }
   0x3   :  { %12 = vsyncpa [#allocation9], 0  ;;  %s577_s12 = smov [#allocation2]   ;;  %s481_s16 = scalar_lea.hbm %s671_s0, 1024 }
   0x4   :  { %s18_s13 = sshll.u32 %s577_s12, 4  ;;  %p482_p0 = scmp.ne.s32.totalorder %s671_s0, %s481_s16  ;;  %s19_s13 = int_to_ptr.vmem [resolvable:$true] %s18_s13 }
   0x5   :  { %p485_p1 = scmp.lt.u32.totalorder %s481_s16, %s671_s0 }
   0x7   :  { %p487_p2 = pnand %p485_p1, %p482_p0 }
   0x9   :  { %490 = shalt.err (!%p487_p2)
}
   0xa   :  { %s491_s21 = scalar_lea.vmem %s19_s13, 1024  ;;  %p496_p4 = scmp.lt.s32.totalorder %s19_s13, %s19_s13 }
   0xb   :  { %p492_p3 = scmp.ne.s32.totalorder %s19_s13, %s491_s21  ;;  %p497_p5 = scmp.lt.s32.totalorder %s491_s21, %s491_s21 }
   0xd   :  { %p498_p6 = por %p497_p5, %p496_p4 }
   0xf   :  { %p499_p7 = pnand %p498_p6, %p492_p3 }
  0x11   :  { %502 = shalt.err (!%p499_p7)
}
  0x12   :  { %s578_s22 = smov 64   ;;  %s579_s23 = smov 4  }
  0x13   :  { %24 = dma.hbm_to_vmem [thread:$0]  %s671_s0, 1024, %s19_s13, [#allocation3], %s578_s22, %s578_s22, %s579_s23  }
  0x14   :  { %s580_s26 = smov [#allocation5]   ;;  %s503_s30 = scalar_lea.hbm %s672_s1, 1024 }
  0x15   :  { %s30_s27 = sshll.u32 %s580_s26, 4  ;;  %p504_p8 = scmp.ne.s32.totalorder %s672_s1, %s503_s30  ;;  %s31_s27 = int_to_ptr.vmem [resolvable:$true] %s30_s27 }
  0x16   :  { %p507_p9 = scmp.lt.u32.totalorder %s503_s30, %s672_s1 }
  0x18   :  { %p509_p10 = pnand %p507_p9, %p504_p8 }
  0x1a   :  { %512 = shalt.err (!%p509_p10)
}
  0x1b   :  { %s513_s8 = scalar_lea.vmem %s31_s27, 1024  ;;  %p518_p12 = scmp.lt.s32.totalorder %s31_s27, %s31_s27 }
  0x1c   :  { %p514_p11 = scmp.ne.s32.totalorder %s31_s27, %s513_s8  ;;  %p519_p13 = scmp.lt.s32.totalorder %s513_s8, %s513_s8 }
  0x1e   :  { %p520_p0 = por %p519_p13, %p518_p12 }
  0x20   :  { %p521_p1 = pnand %p520_p0, %p514_p11 }
  0x22   :  { %524 = shalt.err (!%p521_p1)
}
  0x23   :  { %36 = dma.hbm_to_vmem [thread:$0]  %s672_s1, 1024, %s31_s27, [#allocation6], %s578_s22, %s578_s22, %s579_s23  }
  0x24   :  { %569 = dma.done.wait [#allocation3], 1024  }
  0x25   :  { %570 = vsyncadd [#allocation3], 4294966272 }
  0x26   :  { %571 = dma.done.wait [#allocation6], 1024  }
  0x27   :  { %572 = vsyncadd [#allocation6], 4294966272  ;;  %v465_v0 = vld [vmem:[#allocation5] sm:$0xff]   ;;  %v466_v1 = vld [vmem:[#allocation5 + $0x8] sm:$0xff]   ;;  %s581_s1 = smov [#allocation7]  }
  0x28   :  { %409 = vmatprep.subr.bf16.mxu0 %v465_v0  ;;  %441 = vmatprep.subr.bf16.mxu1 %v465_v0  ;;  %v467_v2 = vld [vmem:[#allocation5 + $0x10] sm:$0xff]   ;;  %v468_v3 = vld [vmem:[#allocation5 + $0x18] sm:$0xff]   ;;  %v473_v4 = vld [vmem:[#allocation2] sm:$0xff]   ;;  %s350_s10 = sshll.u32 %s581_s1, 4  ;;  %s351_s10 = int_to_ptr.vmem [resolvable:$true] %s350_s10 }
  0x29   :  { %410 = vmatpush3.bf16.msra.mxu0 %v465_v0  ;;  %449 = vmatpush3.bf16.msra.mxu1 %v465_v0  ;;  %v469_v5 = vld [vmem:[#allocation5 + $0x20] sm:$0xff]   ;;  %v470_v7 = vld [vmem:[#allocation5 + $0x28] sm:$0xff]   ;;  %v471_v8 = vld [vmem:[#allocation5 + $0x30] sm:$0xff]   ;;  %s525_s11 = scalar_lea.vmem %s351_s10, 2048  ;;  %p530_p3 = scmp.lt.s32.totalorder %s351_s10, %s351_s10 }
  0x2a   :  { %411 = vmatprep.subr.bf16.mxu0 %v466_v1  ;;  %442 = vmatprep.subr.bf16.mxu1 %v466_v1  ;;  %v477_v6 = vld [vmem:[#allocation2 + $0x20] sm:$0xff]   ;;  %v472_v9 = vld [vmem:[#allocation5 + $0x38] sm:$0xff]   ;;  %v474_v10 = vld [vmem:[#allocation2 + $0x8] sm:$0xff]   ;;  %p526_p2 = scmp.ne.s32.totalorder %s351_s10, %s525_s11  ;;  %p531_p4 = scmp.lt.s32.totalorder %s525_s11, %s525_s11 }
  0x2b   :  { %425 = vmatprep.mubr.bf16.mxu0 %v473_v4  ;;  %433 = vmatprep.mubr.bf16.mxu1 %v477_v6  ;;  %v478_v11 = vld [vmem:[#allocation2 + $0x28] sm:$0xff]   ;;  %v475_v12 = vld [vmem:[#allocation2 + $0x10] sm:$0xff]   ;;  %v476_v14 = vld [vmem:[#allocation2 + $0x18] sm:$0xff]  }
  0x2c   :  { %v479_v13 = vld [vmem:[#allocation2 + $0x30] sm:$0xff]   ;;  %v480_v15 = vld [vmem:[#allocation2 + $0x38] sm:$0xff]   ;;  %p532_p5 = por %p531_p4, %p530_p3 }
  0x2d   :  { %412 = vmatpush3.bf16.msra.mxu0 %v466_v1  ;;  %450 = vmatpush3.bf16.msra.mxu1 %v466_v1 }
  0x2e   :  { %413 = vmatprep.subr.bf16.mxu0 %v467_v2  ;;  %443 = vmatprep.subr.bf16.mxu1 %v467_v2  ;;  %p533_p6 = pnand %p532_p5, %p526_p2 }
  0x31   :  { %414 = vmatpush3.bf16.msra.mxu0 %v467_v2  ;;  %451 = vmatpush3.bf16.msra.mxu1 %v467_v2 }
  0x32   :  { %415 = vmatprep.subr.bf16.mxu0 %v468_v3  ;;  %444 = vmatprep.subr.bf16.mxu1 %v468_v3 }
  0x35   :  { %416 = vmatpush3.bf16.msra.mxu0 %v468_v3  ;;  %452 = vmatpush3.bf16.msra.mxu1 %v468_v3 }
  0x36   :  { %417 = vmatprep.subr.bf16.mxu0 %v469_v5  ;;  %445 = vmatprep.subr.bf16.mxu1 %v469_v5 }
  0x39   :  { %418 = vmatpush3.bf16.msra.mxu0 %v469_v5  ;;  %453 = vmatpush3.bf16.msra.mxu1 %v469_v5 }
  0x3a   :  { %419 = vmatprep.subr.bf16.mxu0 %v470_v7  ;;  %446 = vmatprep.subr.bf16.mxu1 %v470_v7 }
  0x3d   :  { %420 = vmatpush3.bf16.msra.mxu0 %v470_v7  ;;  %454 = vmatpush3.bf16.msra.mxu1 %v470_v7 }
  0x3e   :  { %421 = vmatprep.subr.bf16.mxu0 %v471_v8  ;;  %447 = vmatprep.subr.bf16.mxu1 %v471_v8 }
  0x41   :  { %422 = vmatpush3.bf16.msra.mxu0 %v471_v8  ;;  %455 = vmatpush3.bf16.msra.mxu1 %v471_v8 }
  0x42   :  { %423 = vmatprep.subr.bf16.mxu0 %v472_v9  ;;  %448 = vmatprep.subr.bf16.mxu1 %v472_v9 }
  0x45   :  { %424 = vmatpush3.bf16.msra.mxu0 %v472_v9  ;;  %456 = vmatpush3.bf16.msra.mxu1 %v472_v9 }
  0x48   :  { %426 = vmatmul.mubr.bf16.vlgmr.msra.gmra.mrb[0].mxu0 %v474_v10  ;;  %434 = vmatmul.mubr.bf16.vlgmr.msra.gmra.mrb[0].mxu1 %v478_v11 }
  0x49   :  { %429 = vmatprep.mubr.bf16.mxu0 %v475_v12  ;;  %437 = vmatprep.mubr.bf16.mxu1 %v479_v13 }
  0x50   :  { %430 = vmatmul.mubr.bf16.gmra.mrb[4].mxu0 %v476_v14  ;;  %438 = vmatmul.mubr.bf16.gmra.mrb[4].mxu1 %v480_v15 }
 0x11b   :  { %v427_v16 = vpop.f32.mrb[0].mxu0  ;;  %v629_v17 = vpop.f32.mrb[0].mxu1 }
 0x11c   :  { %271 = vst [vmem:[#allocation7 + $0x10] sm:$0xff] %v427_v16  ;;  %v206_v18 = vpop.f32.mrb[1].mxu0  ;;  %279 = vst [vmem:[#allocation7 + $0x50] sm:$0xff] %v629_v17  ;;  %v632_v19 = vpop.f32.mrb[1].mxu1  ;;  %v309_v27 = vmul.f32 %v427_v16, %v427_v16 }
 0x11d   :  { %269 = vst [vmem:[#allocation7] sm:$0xff] %v206_v18  ;;  %v428_v20 = vpop.f32.mrb[2].mxu0  ;;  %277 = vst [vmem:[#allocation7 + $0x40] sm:$0xff] %v632_v19  ;;  %v635_v21 = vpop.f32.mrb[2].mxu1  ;;  %v307_v24 = vmul.f32 %v206_v18, %v206_v18 }
 0x11e   :  { %272 = vst [vmem:[#allocation7 + $0x18] sm:$0xff] %v428_v20  ;;  %v209_v22 = vpop.f32.mrb[3].mxu0  ;;  %280 = vst [vmem:[#allocation7 + $0x58] sm:$0xff] %v635_v21  ;;  %v241_v23 = vpop.f32.mrb[3].mxu1  ;;  %v310_v30 = vmul.f32 %v428_v20, %v428_v20 }
 0x11f   :  { %270 = vst [vmem:[#allocation7 + $0x8] sm:$0xff] %v209_v22  ;;  %v285_v25 = vadd.f32 %v209_v22, %v206_v18  ;;  %v308_v26 = vmul.f32 %v209_v22, %v209_v22  ;;  %278 = vst [vmem:[#allocation7 + $0x48] sm:$0xff] %v241_v23 }
 0x121   :  { %v286_v28 = vadd.f32 %v427_v16, %v285_v25  ;;  %v323_v29 = vadd.f32 %v308_v26, %v307_v24 }
 0x123   :  { %v324_v31 = vadd.f32 %v323_v29, %v309_v27  ;;  %v431_v32 = vpop.f32.mrb[4].mxu0  ;;  %v287_v33 = vadd.f32 %v428_v20, %v286_v28  ;;  %v439_v34 = vpop.f32.mrb[4].mxu1 }
 0x124   :  { %275 = vst [vmem:[#allocation7 + $0x30] sm:$0xff] %v431_v32  ;;  %v222_v35 = vpop.f32.mrb[5].mxu0  ;;  %283 = vst [vmem:[#allocation7 + $0x70] sm:$0xff] %v439_v34  ;;  %v254_v36 = vpop.f32.mrb[5].mxu1 }
 0x125   :  { %273 = vst [vmem:[#allocation7 + $0x20] sm:$0xff] %v222_v35  ;;  %v288_v37 = vadd.f32 %v287_v33, %v222_v35  ;;  %v311_v38 = vmul.f32 %v222_v35, %v222_v35  ;;  %v325_v39 = vadd.f32 %v324_v31, %v310_v30  ;;  %v432_v40 = vpop.f32.mrb[6].mxu0  ;;  %281 = vst [vmem:[#allocation7 + $0x60] sm:$0xff] %v254_v36  ;;  %v440_v41 = vpop.f32.mrb[6].mxu1 }
 0x126   :  { %276 = vst [vmem:[#allocation7 + $0x38] sm:$0xff] %v432_v40  ;;  %v225_v42 = vpop.f32.mrb[7].mxu0  ;;  %284 = vst [vmem:[#allocation7 + $0x78] sm:$0xff] %v440_v41  ;;  %v257_v43 = vpop.f32.mrb[7].mxu1 }
 0x127   :  { %v326_v44 = vadd.f32 %v325_v39, %v311_v38  ;;  %274 = vst [vmem:[#allocation7 + $0x28] sm:$0xff] %v225_v42  ;;  %v289_v45 = vadd.f32 %v288_v37, %v225_v42  ;;  %v312_v46 = vmul.f32 %v225_v42, %v225_v42  ;;  %282 = vst [vmem:[#allocation7 + $0x68] sm:$0xff] %v257_v43 }
 0x128   :  { %536 = shalt.err (!%p533_p6)
}
 0x129   :  { %s537_s14 = scalar_lea.hbm %s673_s2, 2048 }
 0x12a   :  { %p538_p7 = scmp.ne.s32.totalorder %s673_s2, %s537_s14  ;;  %p541_p8 = scmp.lt.u32.totalorder %s537_s14, %s673_s2 }
 0x12c   :  { %p543_p9 = pnand %p541_p8, %p538_p7 }
 0x12e   :  { %546 = shalt.err (!%p543_p9)
}
 0x12f   :  { %s582_s19 = smov 128   ;;  %s583_s20 = smov 8   ;;  %v313_v47 = vmul.f32 %v431_v32, %v431_v32  ;;  %v290_v48 = vadd.f32 %v431_v32, %v289_v45  ;;  %v327_v49 = vadd.f32 %v326_v44, %v312_v46  ;;  %v314_v50 = vmul.f32 %v432_v40, %v432_v40 }
 0x130   :  { %356 = dma.vmem_to_hbm [thread:$0]  %s351_s10, 2048, %s673_s2, [#allocation4], %s582_s19, %s582_s19, %s583_s20   ;;  %v315_v53 = vmul.f32 %v632_v19, %v632_v19  ;;  %v316_v58 = vmul.f32 %v241_v23, %v241_v23  ;;  %v317_v59 = vmul.f32 %v629_v17, %v629_v17  ;;  %v318_v62 = vmul.f32 %v635_v21, %v635_v21 }
 0x131   :  { %v328_v51 = vadd.f32 %v327_v49, %v313_v47  ;;  %v291_v52 = vadd.f32 %v432_v40, %v290_v48  ;;  %v319_v1 = vmul.f32 %v254_v36, %v254_v36  ;;  %v320_v6 = vmul.f32 %v257_v43, %v257_v43  ;;  %s584_s2 = smov [#allocation8]  }
 0x132   :  { %v321_v7 = vmul.f32 %v439_v34, %v439_v34  ;;  %v322_v10 = vmul.f32 %v440_v41, %v440_v41  ;;  %s363_s23 = sshll.u32 %s584_s2, 4  ;;  %s364_s23 = int_to_ptr.vmem [resolvable:$true] %s363_s23 }
 0x133   :  { %v292_v54 = vadd.f32 %v291_v52, %v632_v19  ;;  %v329_v55 = vadd.f32 %v328_v51, %v314_v50  ;;  %s547_s24 = scalar_lea.vmem %s364_s23, 32  ;;  %p552_p11 = scmp.lt.s32.totalorder %s364_s23, %s364_s23 }
 0x134   :  { %p548_p10 = scmp.ne.s32.totalorder %s364_s23, %s547_s24  ;;  %p553_p12 = scmp.lt.s32.totalorder %s547_s24, %s547_s24 }
 0x135   :  { %v330_v56 = vadd.f32 %v329_v55, %v315_v53  ;;  %v293_v57 = vadd.f32 %v292_v54, %v241_v23 }
 0x136   :  { %p554_p13 = por %p553_p12, %p552_p11 }
 0x137   :  { %v294_v60 = vadd.f32 %v629_v17, %v293_v57  ;;  %v331_v61 = vadd.f32 %v330_v56, %v316_v58 }
 0x138   :  { %p555_p0 = pnand %p554_p13, %p548_p10 }
 0x139   :  { %v332_v63 = vadd.f32 %v331_v61, %v317_v59  ;;  %v295_v0 = vadd.f32 %v635_v21, %v294_v60 }
 0x13b   :  { %v296_v2 = vadd.f32 %v295_v0, %v254_v36  ;;  %v333_v3 = vadd.f32 %v332_v63, %v318_v62 }
 0x13d   :  { %v334_v4 = vadd.f32 %v333_v3, %v319_v1  ;;  %v297_v5 = vadd.f32 %v296_v2, %v257_v43 }
 0x13f   :  { %v298_v8 = vadd.f32 %v439_v34, %v297_v5  ;;  %v335_v9 = vadd.f32 %v334_v4, %v320_v6 }
 0x141   :  { %v299_v11 = vadd.f32 %v440_v41, %v298_v8  ;;  %v336_v12 = vadd.f32 %v335_v9, %v321_v7 }
 0x143   :  { %v300_v13 = vrot.slane %v299_v11, 4  ;;  %v337_v14 = vadd.f32 %v336_v12, %v322_v10 }
 0x145   :  { %v301_v15 = vadd.f32 %v300_v13, %v299_v11  ;;  %v338_v16 = vrot.slane %v337_v14, 4 }
 0x147   :  { %v302_v17 = vrot.slane %v301_v15, 2  ;;  %v339_v18 = vadd.f32 %v338_v16, %v337_v14 }
 0x149   :  { %v303_v19 = vadd.f32 %v302_v17, %v301_v15  ;;  %v340_v20 = vrot.slane %v339_v18, 2 }
 0x14b   :  { %v304_v21 = vrot.slane %v303_v19, 1  ;;  %v341_v22 = vadd.f32 %v340_v20, %v339_v18 }
 0x14d   :  { %v305_v23 = vadd.f32 %v304_v21, %v303_v19  ;;  %v342_v24 = vrot.slane %v341_v22, 1 }
 0x14f   :  { %306 = vst [vmem:[#allocation8] sm:$0x1] %v305_v23  ;;  %v343_v25 = vadd.f32 %v342_v24, %v341_v22 }
 0x151   :  { %344 = vst [vmem:[#allocation8 + $0x1] sm:$0x1] %v343_v25 }
 0x152   :  { %558 = shalt.err (!%p555_p0)
}
 0x153   :  { %s559_s27 = scalar_lea.hbm %s674_s3, 32 }
 0x154   :  { %p560_p1 = scmp.ne.s32.totalorder %s674_s3, %s559_s27  ;;  %p563_p2 = scmp.lt.u32.totalorder %s559_s27, %s674_s3 }
 0x156   :  { %p565_p3 = pnand %p563_p2, %p560_p1 }
 0x158   :  { %568 = shalt.err (!%p565_p3)
}
 0x159   :  { %366 = dma.vmem_to_hbm [thread:$0]  %s364_s23, 32, %s674_s3, [#allocation9]  }
 0x15a   :  { %573 = dma.done.wait [#allocation4], 2048  }
 0x15b   :  { %574 = vsyncadd [#allocation4], 4294965248 }
 0x15c   :  { %575 = dma.done.wait [#allocation9], 32  }
 0x15d   :  { %576 = vsyncadd [#allocation9], 4294967264 }
 0x15e   :  { %373 = vsyncpa [#allocation3], 1 }
 0x15f   :  { %374 = vsyncpa [#allocation6], 1 }
 0x160   :  { %375 = vsyncpa [#allocation4], 1 }
 0x161   :  { %376 = vsyncpa [#allocation9], 1 }

</bundles_post_ra>
